<compile_context>
chip_gen: v7x
topology: tpu7x:2x2x1
jax: 0.10.0
libtpu: 0.0.40
codegen_flags: <defaults>
</compile_context>

<pallas_src>
import functools

import numpy as np

import jax
import jax.numpy as jnp
from jax.experimental import pallas as pl
from jax.experimental.pallas import tpu as pltpu


_VMEM_LIMIT = 48 * 1024 * 1024  # fits production tiles on v5e / v6e / v7x


# ---------------------------------------------------------------------------
# host-side parameter construction (module __init__ equivalents)
# ---------------------------------------------------------------------------

def _periodic_hann(win_length):
    n = np.arange(win_length)
    return 0.5 - 0.5 * np.cos(2.0 * np.pi * n / win_length)


def _pad_center(v, size):
    n = v.shape[0]
    lpad = (size - n) // 2
    out = np.zeros(size, dtype=np.float64)
    out[lpad:lpad + n] = v
    return out


def _idft_half_weights(n_fft, win_length, window="hann"):
    """Fold mirror symmetry + window into half-spectrum IDFT weights.

    Returns A, Bm of shape (n_fft//2+1, n_fft) so that
        frames[b, t, o] = real[b, t, :] @ A[:, o] + imag[b, t, :] @ Bm[:, o]
    equals the module's  conv_real(full_real) - conv_imag(full_imag)  (with the
    flip/concat symmetry expansion absorbed into the weights).
    """
    assert window == "hann"
    win = _pad_center(_periodic_hann(win_length), n_fft)
    x, y = np.meshgrid(np.arange(n_fft), np.arange(n_fft))
    W = np.power(np.exp(2j * np.pi / n_fft), x * y) / n_fft   # idft_matrix / n
    C = (W * win[None, :]).T                                   # C[o, i] = W[i, o] * win[o]
    Cr, Ci = np.real(C), np.imag(C)
    F = n_fft // 2 + 1
    A = Cr[:, :F].T.copy()
    Bm = (-Ci[:, :F]).T.copy()
    # mirrored bins i = n - f (f = 1 .. n/2-1): full_real = +real[f], full_imag = -imag[f]
    A[1:F - 1] += Cr[:, F:][:, ::-1].T
    Bm[1:F - 1] += Ci[:, F:][:, ::-1].T
    return A.astype(np.float32), Bm.astype(np.float32)


def _ola_window_sum(n_fft, win_length, window, hop_length, frames_num):
    """Overlap-added squared window (the module's _get_ifft_window), clamped.

    Returned in float64 so the host-side reciprocal keeps full accuracy.
    """
    win_sq = _pad_center(_periodic_hann(win_length), n_fft) ** 2
    n_samples = (frames_num - 1) * hop_length + n_fft
    wsum = np.zeros(n_samples, dtype=np.float64)
    for t in range(frames_num):
        wsum[t * hop_length:t * hop_length + n_fft] += win_sq
    return np.clip(wsum, 1e-11, None)


# ---------------------------------------------------------------------------
# kernel 1: windowed real-IDFT frames (the two Conv1d(kernel_size=1) matmuls)
# ---------------------------------------------------------------------------

def _idft_frames_kernel(re_ref, im_ref, a_ref, b_ref, o_ref):
    # re_ref/im_ref: (tT, F)   a_ref/b_ref: (F, tL)   o_ref: (tT, tL)
    acc = jnp.dot(re_ref[...], a_ref[...], preferred_element_type=jnp.float32)
    acc = acc + jnp.dot(im_ref[...], b_ref[...], preferred_element_type=jnp.float32)
    o_ref[...] = acc.astype(o_ref.dtype)


def _idft_frames(re, im, A, Bm, *, t_tile=256, l_tile=1024):
    """re, im: (B, T, F) -> frames (B, T, L) with L = n_fft (frames-major, lane = sample).

    Grid is (L_tiles, B, T_tiles): the weight blocks are indexed only by the
    OUTERMOST axis, so consecutive grid steps reuse the same weight tile and
    Pallas skips the (large) weight DMA -> each weight tile is fetched from
    HBM exactly once.  re/im blocks are indexed by the inner (b, i) axes.
    """
    B, T, F = re.shape
    L = A.shape[1]
    tT = T if T <= t_tile else t_tile
    tL = L if L <= l_tile else l_tile
    grid = (pl.cdiv(L, tL), B, pl.cdiv(T, tT))
    return pl.pallas_call(
        _idft_frames_kernel,
        out_shape=jax.ShapeDtypeStruct((B, T, L), jnp.float32),
        grid=grid,
        in_specs=[
            pl.BlockSpec((None, tT, F), lambda j, b, i: (b, i, 0)),
            pl.BlockSpec((None, tT, F), lambda j, b, i: (b, i, 0)),
            pl.BlockSpec((F, tL), lambda j, b, i: (0, j)),
            pl.BlockSpec((F, tL), lambda j, b, i: (0, j)),
        ],
        out_specs=pl.BlockSpec((None, tT, tL), lambda j, b, i: (b, i, j)),
        compiler_params=pltpu.CompilerParams(
            dimension_semantics=("parallel", "parallel", "parallel"),
            vmem_limit_bytes=_VMEM_LIMIT,
        ),
    )(re, im, A, Bm)


# ---------------------------------------------------------------------------
# kernel 2: overlap-add (F.fold) + window-sum normalisation — data movement
# ---------------------------------------------------------------------------

def _ola_kernel(frames_ref, inv_wsum_ref, y_ref, *, hop, ratio, T):
    # frames_ref: (1, T, L)  inv_wsum_ref: (n_blocks, hop)  y_ref: (1, n_blocks, hop)
    # n_blocks = T + ratio - 1 ;  y[b, p*hop + w] = sum_k frames[b, p-k, k*hop + w]
    y_ref[...] = jnp.zeros_like(y_ref)
    for k in range(ratio):                                   # ratio = n_fft // hop (4 in prod)
        seg = frames_ref[:, :, pl.ds(k * hop, hop)]          # (1, T, hop), hop-aligned slice
        y_ref[:, pl.ds(k, T), :] = y_ref[:, pl.ds(k, T), :] + seg
    # normalisation: multiply by host-precomputed 1/window_sum (no divide)
    y_ref[...] = y_ref[...] * inv_wsum_ref[...][None, :, :]


def _overlap_add(frames, inv_wsum_blocks, *, hop, ratio):
    B, T, L = frames.shape
    n_blocks = T + ratio - 1
    # TODO(synk): tile the frames axis with an overlap carry for very long
    # clips (T >> 4k); a whole row per batch step is fine at typical T.
    kernel = functools.partial(_ola_kernel, hop=hop, ratio=ratio, T=T)
    return pl.pallas_call(
        kernel,
        out_shape=jax.ShapeDtypeStruct((B, n_blocks, hop), jnp.float32),
        grid=(B,),
        in_specs=[
            pl.BlockSpec((1, T, L), lambda b: (b, 0, 0)),
            pl.BlockSpec((n_blocks, hop), lambda b: (0, 0)),
        ],
        out_specs=pl.BlockSpec((1, n_blocks, hop), lambda b: (b, 0, 0)),
        compiler_params=pltpu.CompilerParams(
            dimension_semantics=("parallel",),
            vmem_limit_bytes=_VMEM_LIMIT,
        ),
    )(frames, inv_wsum_blocks)


# ---------------------------------------------------------------------------
# full forward (ISTFT.forward, non-ONNX path)
# ---------------------------------------------------------------------------

def istft(real_stft, imag_stft, length, *, n_fft, hop_length=None, win_length=None,
          window="hann", center=True):
    """real_stft/imag_stft: (B, 1, T, n_fft//2+1) float32 -> (B, samples) float32."""
    win_length = n_fft if win_length is None else win_length
    hop_length = win_length // 4 if hop_length is None else hop_length
    assert win_length == n_fft, "F.fold path in the reference requires win_length == n_fft"
    assert n_fft % hop_length == 0, "hop must divide n_fft for the vectorized overlap-add"
    B, C, T, F = real_stft.shape
    assert C == 1 and F == n_fft // 2 + 1

    A, Bm = _idft_half_weights(n_fft, win_length, window)
    re = real_stft[:, 0]                      # (B, T, F) — natural layout, no transpose
    im = imag_stft[:, 0]
    frames = _idft_frames(re, im, jnp.asarray(A), jnp.asarray(Bm))   # (B, T, n_fft)

    ratio = n_fft // hop_length
    n_blocks = T + ratio - 1
    wsum = _ola_window_sum(n_fft, win_length, window, hop_length, T)  # (N,) float64, clamped
    inv_wsum = (1.0 / wsum).astype(np.float32)
    inv_wsum_blocks = jnp.asarray(inv_wsum.reshape(n_blocks, hop_length))
    y = _overlap_add(frames, inv_wsum_blocks, hop=hop_length, ratio=ratio)
    y = y.reshape(B, n_blocks * hop_length)   # free row-major merge

    # _trim_edges
    if length is None:
        if center:
            y = y[:, n_fft // 2: -(n_fft // 2)]
    else:
        start = n_fft // 2 if center else 0
        y = y[:, start:start + length]
    return y


# ---------------------------------------------------------------------------
# float64 numpy reference following the PyTorch module verbatim
# ---------------------------------------------------------------------------

def _istft_reference(real_stft, imag_stft, length, n_fft, hop_length, win_length, center=True):
    real = np.asarray(real_stft, np.float64)[:, 0].transpose(0, 2, 1)   # (B, F, T)
    imag = np.asarray(imag_stft, np.float64)[:, 0].transpose(0, 2, 1)
    full_real = np.concatenate([real, real[:, 1:-1][:, ::-1]], axis=1)  # (B, n, T)
    full_imag = np.concatenate([imag, -imag[:, 1:-1][:, ::-1]], axis=1)
    win = _pad_center(_periodic_hann(win_length), n_fft)
    x, y = np.meshgrid(np.arange(n_fft), np.arange(n_fft))
    W = np.power(np.exp(2j * np.pi / n_fft), x * y) / n_fft
    Cr = np.real(W * win[None, :]).T
    Ci = np.imag(W * win[None, :]).T
    s_real = (np.einsum("oi,bit->bot", Cr, full_real)
              - np.einsum("oi,bit->bot", Ci, full_imag))
    B, _, T = s_real.shape
    N = (T - 1) * hop_length + n_fft
    out = np.zeros((B, N), np.float64)
    for t in range(T):
        out[:, t * hop_length:t * hop_length + n_fft] += s_real[:, :, t]
    wsum = _ola_window_sum(n_fft, win_length, "hann", hop_length, T)
    out = out / wsum[None, :]
    if length is None:
        if center:
            out = out[:, n_fft // 2: -(n_fft // 2)]
    else:
        start = n_fft // 2 if center else 0
        out = out[:, start:start + length]
    return out


if __name__ == "__main__":
    # Small shapes consistent with the module (n_fft=2048, hop=512 scaled down).
    N_FFT = 256
    HOP = 64           # n_fft // 4 (module default)
    WIN = 256
    B, T = 2, 16
    F = N_FFT // 2 + 1
    LENGTH = (T - 1) * HOP

    key = jax.random.PRNGKey(0)
    k1, k2 = jax.random.split(key)
    real_stft = jax.random.normal(k1, (B, 1, T, F), dtype=jnp.float32)
    imag_stft = jax.random.normal(k2, (B, 1, T, F), dtype=jnp.float32)

    out = istft(real_stft, imag_stft, LENGTH, n_fft=N_FFT, hop_length=HOP, win_length=WIN)
    jax.block_until_ready(out)

    ref = _istft_reference(np.asarray(real_stft), np.asarray(imag_stft),
                           LENGTH, N_FFT, HOP, WIN)
    assert out.shape == ref.shape, (out.shape, ref.shape)
    assert out.dtype == jnp.float32
    assert np.allclose(np.asarray(out, np.float64), ref, rtol=1e-4, atol=1e-4), \
        "mismatch vs float64 reference ISTFT"

    print("KERNEL_OK")
</pallas_src>

<mosaic_0001>
module attributes {stable_mosaic.version = 11 : i64} {
  func.func @_idft_frames_kernel(%arg0: i32, %arg1: i32, %arg2: i32, %arg3: memref<1x16x129xf32, #tpu.memory_space<vmem>>, %arg4: memref<1x16x129xf32, #tpu.memory_space<vmem>>, %arg5: memref<129x256xf32, #tpu.memory_space<vmem>>, %arg6: memref<129x256xf32, #tpu.memory_space<vmem>>, %arg7: memref<1x16x256xf32, #tpu.memory_space<vmem>>) attributes {dimension_semantics = [#tpu.dimension_semantics<parallel>, #tpu.dimension_semantics<parallel>, #tpu.dimension_semantics<parallel>], iteration_bounds = array<i64: 1, 2, 1>, scalar_prefetch = 0 : i64, scratch_operands = 0 : i64, tpu.core_type = #tpu.core_type<tc>, window_params = [{transform_indices = @transform_0, window_bounds = array<i64: 1, 16, 129>}, {transform_indices = @transform_1, window_bounds = array<i64: 1, 16, 129>}, {transform_indices = @transform_2, window_bounds = array<i64: 129, 256>}, {transform_indices = @transform_3, window_bounds = array<i64: 129, 256>}, {transform_indices = @transform_4, window_bounds = array<i64: 1, 16, 256>}]} {
    %c0 = arith.constant 0 : index
    %c0_0 = arith.constant 0 : index
    %c0_1 = arith.constant 0 : index
    %0 = vector.load %arg3[%c0, %c0_0, %c0_1] : memref<1x16x129xf32, #tpu.memory_space<vmem>>, vector<1x16x129xf32>
    %1 = vector.shape_cast %0 : vector<1x16x129xf32> to vector<16x129xf32>
    %c0_2 = arith.constant 0 : index
    %c0_3 = arith.constant 0 : index
    %2 = vector.load %arg5[%c0_2, %c0_3] : memref<129x256xf32, #tpu.memory_space<vmem>>, vector<129x256xf32>
    %cst = arith.constant dense<0.000000e+00> : vector<16x256xf32>
    %3 = tpu.matmul %1, %2, %cst {dimension_numbers = #tpu.dot_dimension_numbers<[1], [0], [0], [1], [0, 0, 1, 1], [], []>} : vector<16x129xf32>, vector<129x256xf32>, vector<16x256xf32> -> vector<16x256xf32>
    %c0_4 = arith.constant 0 : index
    %c0_5 = arith.constant 0 : index
    %c0_6 = arith.constant 0 : index
    %4 = vector.load %arg4[%c0_4, %c0_5, %c0_6] : memref<1x16x129xf32, #tpu.memory_space<vmem>>, vector<1x16x129xf32>
    %5 = vector.shape_cast %4 : vector<1x16x129xf32> to vector<16x129xf32>
    %c0_7 = arith.constant 0 : index
    %c0_8 = arith.constant 0 : index
    %6 = vector.load %arg6[%c0_7, %c0_8] : memref<129x256xf32, #tpu.memory_space<vmem>>, vector<129x256xf32>
    %cst_9 = arith.constant dense<0.000000e+00> : vector<16x256xf32>
    %7 = tpu.matmul %5, %6, %cst_9 {dimension_numbers = #tpu.dot_dimension_numbers<[1], [0], [0], [1], [0, 0, 1, 1], [], []>} : vector<16x129xf32>, vector<129x256xf32>, vector<16x256xf32> -> vector<16x256xf32>
    %8 = arith.addf %3, %7 : vector<16x256xf32>
    %c0_10 = arith.constant 0 : index
    %c0_11 = arith.constant 0 : index
    %c0_12 = arith.constant 0 : index
    %9 = vector.load %arg7[%c0_10, %c0_11, %c0_12] : memref<1x16x256xf32, #tpu.memory_space<vmem>>, vector<1x16x256xf32>
    %10 = vector.shape_cast %9 : vector<1x16x256xf32> to vector<16x256xf32>
    %11 = vector.shape_cast %8 : vector<16x256xf32> to vector<1x16x256xf32>
    tpu.vector_store %arg7[%c0_10, %c0_11, %c0_12], %11 {strides = array<i32>} : memref<1x16x256xf32, #tpu.memory_space<vmem>>, vector<1x16x256xf32>,
    return
  }
  func.func @transform_0(%arg0: i32, %arg1: i32, %arg2: i32) -> (i32, i32, i32) {
    %c0_i32 = arith.constant 0 : i32
    %c0_i32_0 = arith.constant 0 : i32
    return %arg1, %arg2, %c0_i32 : i32, i32, i32
  }
  func.func @transform_1(%arg0: i32, %arg1: i32, %arg2: i32) -> (i32, i32, i32) {
    %c0_i32 = arith.constant 0 : i32
    %c0_i32_0 = arith.constant 0 : i32
    return %arg1, %arg2, %c0_i32 : i32, i32, i32
  }
  func.func @transform_2(%arg0: i32, %arg1: i32, %arg2: i32) -> (i32, i32) {
    %c0_i32 = arith.constant 0 : i32
    %c0_i32_0 = arith.constant 0 : i32
    return %c0_i32, %arg0 : i32, i32
  }
  func.func @transform_3(%arg0: i32, %arg1: i32, %arg2: i32) -> (i32, i32) {
    %c0_i32 = arith.constant 0 : i32
    %c0_i32_0 = arith.constant 0 : i32
    return %c0_i32, %arg0 : i32, i32
  }
  func.func @transform_4(%arg0: i32, %arg1: i32, %arg2: i32) -> (i32, i32, i32) {
    %c0_i32 = arith.constant 0 : i32
    return %arg1, %arg2, %arg0 : i32, i32, i32
  }
}

</mosaic_0001>

<bundles_post_ra>
// kernel: tpu_custom_call.1
= control target key start
LH: loop header
LB: loop body
LE: loop exit
PB: predicated region body
PF: predicated region fallthrough
CT: control target
= control target key end

     0   :  { %s1531_s0 = inlined_call_operand.hbm [shape: f32[2,16,129], index: 0, kind: input, shape index: {}]   ;;  %s1532_s1 = inlined_call_operand.hbm [shape: f32[2,16,129], index: 1, kind: input, shape index: {}]   ;;  %s1533_s2 = inlined_call_operand.hbm [shape: f32[129,256], index: 2, kind: input, shape index: {}]   ;;  %s1534_s3 = inlined_call_operand.hbm [shape: f32[129,256], index: 3, kind: input, shape index: {}]   ;;  %s1535_s4 = inlined_call_operand.hbm [shape: f32[2,16,256], index: 4, kind: output, shape index: {}]  }
   0x1   :  { %1545 = sst [smem:[#allocation18_spill]] %s1531_s0 }
   0x2   :  { %1546 = sst [smem:[#allocation19_spill]] %s1533_s2 }
   0x3   :  { %1547 = sst [smem:[#allocation20_spill]] %s1534_s3 }
   0x4   :  { %9 = vsyncpa [#allocation3], 0 }
   0x5   :  { %11 = vsyncpa [#allocation3 + $0x1], 0 }
   0x6   :  { %12 = vsyncpa [#allocation6], 0 }
   0x7   :  { %14 = vsyncpa [#allocation6 + $0x1], 0 }
   0x8   :  { %15 = vsyncpa [#allocation9], 0 }
   0x9   :  { %16 = vsyncpa [#allocation4], 0 }
   0xa   :  { %18 = vsyncpa [#allocation4 + $0x1], 0  ;;  %s1200_s15 = smov 0   ;;  %s1202_s16 = smov 0  }
   0xb   :  { %s1204_s17 = smov 0   ;;  %s1206_s18 = smov 0  }
   0xc   :  { %s1208_s19 = smov 0   ;;  %s1210_s20 = smov 0  }
   0xd LB: > { %1548 = sst [smem:[#allocation16_spill]] %s1160_s19  ;;  %s1231_s21 = sadd.s32 4294967295, %s1164_s20   ;;  %s1164_s20 = sphi %s1210_s20, %s24_s20   ;;  %s1160_s19 = sphi %s1208_s19, %s1571_s19   ;;  %s1156_s18 = sphi %s1206_s18, %s1570_s18   ;;  %s1152_s17 = sphi %s1204_s17, %s1574_s17   ;;  %s1148_s16 = sphi %s1202_s16, %s1573_s16   ;;  %s1144_s15 = sphi %s1200_s15, %s1572_s15  }
   0xe   : > { %s761_s22 = sadd.s32 4294967294, %s1164_s20   ;;  %p65_p0 = scmp.ne.s32.totalorder %s1148_s16, %s1144_s15 }
   0xf   : > { %p1536_p1 = scmp.eq.s32.totalorder %s1231_s21, 0  ;;  %p179_p3 = scmp.eq.s32.totalorder %s761_s22, 1 }
  0x10   : > { %p762_p5 = scmp.ge.s32.totalorder %s1164_s20, 1  ;;  %p186_p7 = scmp.lt.s32.totalorder %s1164_s20, 3 }
  0x11   : > { %p1240_p4 = por %p1536_p1, %p65_p0  ;;  %p1245_p6 = por %p179_p3, %p65_p0 }
  0x12   : > { %p1250_p8 = pnand %p762_p5, %p186_p7  ;;  %s1166_s26 = smov [#allocation7]  }
  0x13   : > { %s1549_s23 = scalar_select %p1240_p4, 1, 0 }
  0x14   : > { %s1550_s24 = scalar_select %p1245_p6, 1, 0 }
  0x15   : > { %s201_s27 = sshll.u32 %s1166_s26, 4  ;;  %p876_p9 = pneg %p1250_p8  ;;  %s1254_s27 = int_to_ptr.vmem [resolvable:$true] %s201_s27 }
  0x16   : > { %s1167_s29 = smov [#allocation8]   ;;  %s1553_s2 = sld [smem:[#allocation19_spill]] }
  0x17   : > { %p1261_p11 = pnand %p876_p9, %p1536_p1  ;;  %s217_s30 = sshll.u32 %s1167_s29, 4  ;;  %s1265_s30 = int_to_ptr.vmem [resolvable:$true] %s217_s30 }
  0x19   : > { %p956_p13 = pneg %p1261_p11 }
  0x1c   : > { %s954_s7 = scalar_lea.hbm %s1553_s2, 4352 }
  0x1d   : > { %p955_p12 = scmp.ne.s32.totalorder %s1553_s2, %s954_s7  ;;  %p961_p5 = scmp.lt.u32.totalorder %s954_s7, %s1553_s2 }
  0x1f   : > { %p957_p0 = pnand %p956_p13, %p955_p12 }
  0x21   : > { %p958_p3 = pneg %p957_p0 }
  0x23   : > { %p963_p7 = pnand %p961_p5, %p958_p3 }
  0x25   : > { %966 = shalt.err (!%p963_p7)
}
  0x26   : > { %s967_s12 = scalar_lea.vmem %s1254_s27, 4352  ;;  %p975_p2 = scmp.lt.s32.totalorder %s1254_s27, %s1254_s27 }
  0x27   : > { %p968_p9 = scmp.ne.s32.totalorder %s1254_s27, %s967_s12  ;;  %p976_p12 = scmp.lt.s32.totalorder %s967_s12, %s967_s12 }
  0x29   : > { %p970_p10 = pnand %p968_p9, %p956_p13  ;;  %p977_p0 = por %p976_p12, %p975_p2 }
  0x2b   : > { %p971_p1 = pneg %p970_p10 }
  0x2d   : > { %p978_p6 = pnand %p977_p0, %p971_p1 }
  0x2f   : > { %981 = shalt.err (!%p978_p6)
}
  0x30   : > { %s1537_s13 = smov 256   ;;  %s1539_s14 = smov 16  }
  0x31   : > { %879 = dma.hbm_to_vmem [thread:$0]  (!%p1261_p11), %s1553_s2, 4352, %s1254_s27, [#allocation6], %s1537_s13, %s1537_s13, %s1539_s14  }
  0x32   : > { %s1554_s3 = sld [smem:[#allocation20_spill]] }
  0x38   : > { %s982_s6 = scalar_lea.hbm %s1554_s3, 4352 }
  0x39   : > { %p983_p1 = scmp.ne.s32.totalorder %s1554_s3, %s982_s6  ;;  %p989_p10 = scmp.lt.u32.totalorder %s982_s6, %s1554_s3 }
  0x3b   : > { %p985_p2 = pnand %p983_p1, %p956_p13 }
  0x3d   : > { %p986_p6 = pneg %p985_p2 }
  0x3f   : > { %p991_p3 = pnand %p989_p10, %p986_p6 }
  0x41   : > { %994 = shalt.err (!%p991_p3)
}
  0x42   : > { %s995_s27 = scalar_lea.vmem %s1265_s30, 4352  ;;  %p1003_p12 = scmp.lt.s32.totalorder %s1265_s30, %s1265_s30 }
  0x43   : > { %p996_p5 = scmp.ne.s32.totalorder %s1265_s30, %s995_s27  ;;  %p1004_p0 = scmp.lt.s32.totalorder %s995_s27, %s995_s27 }
  0x45   : > { %p998_p7 = pnand %p996_p5, %p956_p13  ;;  %p1005_p1 = por %p1004_p0, %p1003_p12 }
  0x47   : > { %p999_p9 = pneg %p998_p7 }
  0x49   : > { %p1006_p2 = pnand %p1005_p1, %p999_p9 }
  0x4b   : > { %1009 = shalt.err (!%p1006_p2)
}
  0x4c   : > { %882 = dma.hbm_to_vmem [thread:$0]  (!%p1261_p11), %s1554_s3, 4352, %s1265_s30, [#allocation9], %s1537_s13, %s1537_s13, %s1539_s14  }
  0x4d   : > { %s39_s28 = sadd.s32 1, %s1160_s19  ;;  %s52_s22 = sadd.s32 1, %s1152_s17 }
  0x4e   : > { %p41_p13 = scmp.ge.s32.totalorder %s39_s28, 2  ;;  %p59_p6 = scmp.ne.s32.totalorder %s1152_s17, %s1148_s16 }
  0x4f   : > { %p60_p10 = scmp.eq.s32.totalorder %s1164_s20, 0  ;;  %p896_p3 = scmp.lt.s32.totalorder %s1164_s20, 2 }
  0x50   : > { %s1576_s28 = smov (%p41_p13, %s39_s28), 0  ;;  %p1556_p7 = scmp.eq.s32.totalorder %s1231_s21, 1 }
  0x51   : > { %1555 = sst [smem:[#allocation17_spill]] %s1576_s28  ;;  %p61_p5 = por %p60_p10, %p59_p6 }
  0x52   : > { %p1335_p9 = por %p1556_p7, %p59_p6  ;;  %s47_s29 = ssub.s32 %s1160_s19, %s1576_s28 }
  0x53   : > { %s231_s5 = sand.u32 1, %s1152_s17   ;;  %p50_p12 = scmp.eq.s32.totalorder %s47_s29, 0 }
  0x54   : > { %s1557_s26 = scalar_select %p1335_p9, 1, 0 }
  0x55   : > { %s1342_s30 = sshll.u32 %s231_s5, 5  ;;  %s791_s6 = sshll.u32 %s1160_s19, 9 }
  0x56   : > { %s1346_s7 = scalar_select %p50_p12, %s1152_s17, %s52_s22  }
  0x57   : > { %s1558_s0 = sld [smem:[#allocation18_spill]]  ;;  %s235_s27 = scalar_lea.vmem [#allocation2], %s1342_s30 }
  0x58   : > { %s245_s11 = sshll.u32 %s235_s27, 4  ;;  %p1356_p11 = pnand %p896_p3, %p61_p5  ;;  %s1360_s11 = int_to_ptr.vmem [resolvable:$true] %s245_s11 }
  0x59   : > { %s1365_s8 = scalar_lea.hbm %s1532_s1, %s791_s6  ;;  %s1367_s9 = scalar_lea.sflag [#allocation3], %s231_s5 }
  0x5a   : > { %p1012_p1 = pneg %p1356_p11 }
  0x5d   : > { %s1351_s10 = scalar_lea.hbm %s1558_s0, %s791_s6  ;;  %s1015_s2 = scalar_lea.hbm %s1558_s0, 1024 }
  0x5e   : > { %s1010_s13 = scalar_lea.hbm %s1351_s10, 512  ;;  %p1016_p6 = scmp.lt.u32.totalorder %s1351_s10, %s1558_s0 }
  0x5f   : > { %p1011_p0 = scmp.ne.s32.totalorder %s1351_s10, %s1010_s13  ;;  %p1017_p10 = scmp.lt.u32.totalorder %s1015_s2, %s1010_s13 }
  0x60   : > { %p1019_p5 = scmp.lt.u32.totalorder %s1010_s13, %s1351_s10 }
  0x61   : > { %p1013_p2 = pnand %p1012_p1, %p1011_p0  ;;  %p1018_p3 = por %p1017_p10, %p1016_p6 }
  0x63   : > { %p1014_p13 = pneg %p1013_p2  ;;  %p1020_p7 = por %p1019_p5, %p1018_p3 }
  0x65   : > { %p1021_p12 = pnand %p1020_p7, %p1014_p13 }
  0x67   : > { %1024 = shalt.err (!%p1021_p12)
}
  0x68   : > { %s1025_s5 = scalar_lea.vmem %s1360_s11, 512  ;;  %s1170_s14 = smov [#allocation2]  }
  0x69   : > { %p1026_p0 = scmp.ne.s32.totalorder %s1360_s11, %s1025_s5  ;;  %s1030_s6 = sshll.u32 %s1170_s14, 4  ;;  %s1031_s6 = int_to_ptr.vmem [resolvable:$false] %s1030_s6 }
  0x6a   : > { %s1032_s3 = scalar_lea.vmem %s1031_s6, 1024  ;;  %p1033_p4 = scmp.lt.s32.totalorder %s1360_s11, %s1031_s6 }
  0x6b   : > { %p1028_p2 = pnand %p1026_p0, %p1012_p1  ;;  %p1034_p6 = scmp.lt.s32.totalorder %s1032_s3, %s1025_s5 }
  0x6d   : > { %p1029_p9 = pneg %p1028_p2  ;;  %p1035_p10 = por %p1034_p6, %p1033_p4 }
  0x6f   : > { %p1036_p3 = pnand %p1035_p10, %p1029_p9 }
  0x71   : > { %1039 = shalt.err (!%p1036_p3)
}
  0x72   : > { %s1560_s2 = smov 16   ;;  %s1561_s13 = smov 256  }
  0x73   : > { %886 = dma.hbm_to_vmem [thread:$0]  (!%p1356_p11), %s1351_s10, 512, %s1360_s11, %s1367_s9, %s1561_s13, %s1561_s13, %s1560_s2  }
  0x74   : > { %s259_s28 = scalar_lea.vmem [#allocation5], %s1342_s30  ;;  %s255_s29 = sand.u32 1, %s1164_s20  }
  0x75   : > { %s269_s22 = sshll.u32 %s259_s28, 4  ;;  %s1402_s27 = scalar_lea.sflag [#allocation6], %s255_s29  ;;  %s1400_s22 = int_to_ptr.vmem [resolvable:$true] %s269_s22 }
  0x76   : > { %s1040_s5 = scalar_lea.hbm %s1365_s8, 512  ;;  %s1045_s3 = scalar_lea.hbm %s1532_s1, 1024 }
  0x77   : > { %p1041_p4 = scmp.ne.s32.totalorder %s1365_s8, %s1040_s5  ;;  %p1046_p5 = scmp.lt.u32.totalorder %s1365_s8, %s1532_s1 }
  0x78   : > { %p1047_p7 = scmp.lt.u32.totalorder %s1045_s3, %s1040_s5  ;;  %p1049_p0 = scmp.lt.u32.totalorder %s1040_s5, %s1365_s8 }
  0x79   : > { %p1043_p9 = pnand %p1041_p4, %p1012_p1 }
  0x7a   : > { %p1048_p12 = por %p1047_p7, %p1046_p5 }
  0x7b   : > { %p1044_p13 = pneg %p1043_p9 }
  0x7c   : > { %p1050_p2 = por %p1049_p0, %p1048_p12 }
  0x7e   : > { %p1051_p6 = pnand %p1050_p2, %p1044_p13 }
  0x80   : > { %1054 = shalt.err (!%p1051_p6)
}
  0x81   : > { %s1055_s30 = scalar_lea.vmem %s1400_s22, 512  ;;  %s1171_s10 = smov [#allocation5]  }
  0x82   : > { %p1056_p10 = scmp.ne.s32.totalorder %s1400_s22, %s1055_s30  ;;  %s1060_s11 = sshll.u32 %s1171_s10, 4  ;;  %s1061_s11 = int_to_ptr.vmem [resolvable:$false] %s1060_s11 }
  0x83   : > { %s1062_s0 = scalar_lea.vmem %s1061_s11, 1024  ;;  %p1063_p9 = scmp.lt.s32.totalorder %s1400_s22, %s1061_s11 }
  0x84   : > { %p1058_p3 = pnand %p1056_p10, %p1012_p1  ;;  %p1064_p5 = scmp.lt.s32.totalorder %s1062_s0, %s1055_s30 }
  0x86   : > { %p1059_p4 = pneg %p1058_p3  ;;  %p1065_p7 = por %p1064_p5, %p1063_p9 }
  0x88   : > { %p1066_p12 = pnand %p1065_p7, %p1059_p4 }
  0x8a   : > { %1069 = shalt.err (!%p1066_p12)
}
  0x8b   : > { %889 = dma.hbm_to_vmem [thread:$0]  (!%p1356_p11), %s1365_s8, 512, %s1400_s22, %s1402_s27, %s1561_s13, %s1561_s13, %s1560_s2  }
  0x8c   : > { %281 = sbr.rel (%p1250_p8) target bundleno = 430 (0x1ae), region = 36  ;;  %s1434_s19 = sand.u32 (!%p1250_p8), 1, %s1148_s16  }
  0x8d   : > { %s1437_s9 = sshll.u32 (!%p1250_p8), %s1434_s19, 5  ;;  %s284_s12 = scalar_lea.sflag (!%p1250_p8), [#allocation3], %s1434_s19 }
  0x8e   : > { %s1441_s28 = scalar_lea.vmem (!%p1250_p8), [#allocation2], %s1437_s9  ;;  %p1562_p1 = scmp.ne.s32.totalorder (!%p1250_p8), %s1549_s23, 0 }
  0x93   : > { %1123 = dma.done.wait (%p1562_p1), %s284_s12, 512  }
  0x94   : > { %1125 = vsyncadd (%p1562_p1), %s284_s12, 4294966784  ;;  %s292_s25 = sand.u32 1, %s1231_s21   ;;  %s1449_s2 = scalar_lea.vmem [#allocation5], %s1437_s9 }
  0x95   : > { %s293_s8 = scalar_lea.sflag [#allocation6], %s292_s25 }
  0x96   : > { %1127 = dma.done.wait (%p1562_p1), %s293_s8, 512  }
  0x97   : > { %1129 = vsyncadd (%p1562_p1), %s293_s8, 4294966784  ;;  %p1563_p8 = scmp.eq.s32.totalorder %s1231_s21, 0 }
  0x99   : > { %1131 = dma.done.wait (%p1563_p8), [#allocation6], 4352   ;;  %p1564_p11 = pmov %p1563_p8 }
  0x9a   : > { %p1565_p13 = pmov %p1563_p8 }
  0x9b   : > { %1133 = vsyncadd (%p1564_p11), [#allocation6], 4294962944 }
  0x9c   : > { %1135 = dma.done.wait (%p1565_p13), [#allocation9], 4352   ;;  %p1566_p0 = pmov %p1563_p8 }
  0x9d   : > { %v383_v0 = vld [vmem:[#allocation8 + $0x8] sm:$0xff]  ;;  %v385_v1 = vld [vmem:[#allocation8 + $0x18] sm:$0xff]  ;;  %v382_v5 = vld [vmem:[#allocation8] sm:$0xff]  ;;  %vm416_vm0 = vcmask 7168   ;;  %vm423_vm1 = vcmask 1040384   ;;  %s333_s21 = scalar_lea.vmem [#allocation10], %s1437_s9 }
  0x9e   : > { %1137 = vsyncadd (%p1566_p0), [#allocation9], 4294962944  ;;  %v345_v2 = vld [vmem:[#allocation7 + $0x8] sm:$0xff]  ;;  %v794_v3 = vpack.c.bf16 %v385_v1, %v383_v0  ;;  %v347_v4 = vld [vmem:[#allocation7 + $0x18] sm:$0xff]  ;;  %s619_s23 = sshll.u32 %s333_s21, 4  ;;  %s793_s13 = sshll.u32 %s1156_s18, 9  ;;  %s1477_s23 = int_to_ptr.vmem [resolvable:$true] %s619_s23 }
  0x9f   : > { %v384_v6 = vld [vmem:[#allocation8 + $0x10] sm:$0xff]  ;;  %v826_v7 = vpack.c.bf16 %v347_v4, %v345_v2  ;;  %v346_v10 = vld [vmem:[#allocation7 + $0x10] sm:$0xff]  ;;  %v387_v11 = vld [vmem:[#allocation8 + $0x28] sm:$0xff]  ;;  %s1482_s27 = scalar_lea.hbm %s1535_s4, %s793_s13  ;;  %s601_s18 = scalar_lea.sflag [#allocation4], %s1434_s19 }
  0xa0   : > { %v796_v8 = vpack.c.bf16 %v384_v6, %v382_v5  ;;  %v344_v9 = vld [vmem:[#allocation7] sm:$0xff]  ;;  %795 = vmatprep.subr.bf16.mxu1 %v794_v3  ;;  %v389_v13 = vld [vmem:[#allocation8 + $0x38] sm:$0xff]  ;;  %v351_v15 = vld [vmem:[#allocation7 + $0x38] sm:$0xff]  ;;  %s1070_s5 = scalar_lea.vmem %s1477_s23, 512  ;;  %p1567_p6 = scmp.ne.s32.totalorder %s1557_s26, 0 }
  0xa1   : > { %v828_v12 = vpack.c.bf16 %v346_v10, %v344_v9  ;;  %v349_v14 = vld [vmem:[#allocation7 + $0x28] sm:$0xff]  ;;  %827 = vmatprep.subr.bf16.mxu0 %v826_v7  ;;  %v798_v16 = vpack.c.bf16 %v389_v13, %v387_v11  ;;  %v386_v18 = vld [vmem:[#allocation8 + $0x20] sm:$0xff]  ;;  %v388_v19 = vld [vmem:[#allocation8 + $0x30] sm:$0xff]  ;;  %p1071_p2 = scmp.ne.s32.totalorder %s1477_s23, %s1070_s5  ;;  %s1172_s14 = smov [#allocation10]  }
  0xa2   : > { %797 = vmatpush1.bf16.msra.mxu1 %v796_v8  ;;  %v830_v17 = vpack.c.bf16 %v351_v15, %v349_v14  ;;  %v348_v20 = vld [vmem:[#allocation7 + $0x20] sm:$0xff]  ;;  %v800_v21 = vpack.c.bf16 %v388_v19, %v386_v18  ;;  %v350_v22 = vld [vmem:[#allocation7 + $0x30] sm:$0xff]  ;;  %v391_v23 = vld [vmem:[#allocation8 + $0x48] sm:$0xff]  ;;  %s1074_s6 = sshll.u32 %s1172_s14, 4  ;;  %s1075_s6 = int_to_ptr.vmem [resolvable:$false] %s1074_s6 }
  0xa3   : > { %829 = vmatpush1.bf16.msra.mxu0 %v828_v12  ;;  %v393_v24 = vld [vmem:[#allocation8 + $0x58] sm:$0xff]  ;;  %799 = vmatprep.subr.bf16.mxu1 %v798_v16  ;;  %v832_v25 = vpack.c.bf16 %v350_v22, %v348_v20  ;;  %v355_v28 = vld [vmem:[#allocation7 + $0x58] sm:$0xff]  ;;  %v390_v29 = vld [vmem:[#allocation8 + $0x40] sm:$0xff]  ;;  %p1072_p10 = pnand %p1071_p2, %p1567_p6  ;;  %s1076_s3 = scalar_lea.vmem %s1075_s6, 1024 }
  0xa4   : > { %831 = vmatprep.subr.bf16.mxu0 %v830_v17  ;;  %v802_v26 = vpack.c.bf16 %v393_v24, %v391_v23  ;;  %v353_v27 = vld [vmem:[#allocation7 + $0x48] sm:$0xff]  ;;  %v392_v31 = vld [vmem:[#allocation8 + $0x50] sm:$0xff]  ;;  %v354_v33 = vld [vmem:[#allocation7 + $0x50] sm:$0xff]  ;;  %p1077_p4 = scmp.lt.s32.totalorder %s1477_s23, %s1075_s6  ;;  %p1078_p9 = scmp.lt.s32.totalorder %s1076_s3, %s1070_s5 }
  0xa5   : > { %v834_v30 = vpack.c.bf16 %v355_v28, %v353_v27  ;;  %v352_v32 = vld [vmem:[#allocation7 + $0x40] sm:$0xff]  ;;  %v804_v34 = vpack.c.bf16 %v392_v31, %v390_v29  ;;  %v395_v35 = vld [vmem:[#allocation8 + $0x68] sm:$0xff]  ;;  %v397_v36 = vld [vmem:[#allocation8 + $0x78] sm:$0xff]  ;;  %p1073_p3 = pneg %p1072_p10 }
  0xa6   : > { %801 = vmatpush1.bf16.msra.mxu1 %v800_v21  ;;  %v357_v37 = vld [vmem:[#allocation7 + $0x68] sm:$0xff]  ;;  %v836_v38 = vpack.c.bf16 %v354_v33, %v352_v32  ;;  %v806_v39 = vpack.c.bf16 %v397_v36, %v395_v35  ;;  %v359_v40 = vld [vmem:[#allocation7 + $0x78] sm:$0xff]  ;;  %v394_v41 = vld [vmem:[#allocation8 + $0x60] sm:$0xff]  ;;  %p1079_p5 = por %p1078_p9, %p1077_p4 }
  0xa7   : > { %833 = vmatpush1.bf16.msra.mxu0 %v832_v25  ;;  %803 = vmatprep.subr.bf16.mxu1 %v802_v26  ;;  %v396_v42 = vld [vmem:[#allocation8 + $0x70] sm:$0xff]  ;;  %v838_v43 = vpack.c.bf16 %v359_v40, %v357_v37  ;;  %v358_v45 = vld [vmem:[#allocation7 + $0x70] sm:$0xff]  ;;  %v399_v46 = vld [vmem:[#allocation8 + $0x88] sm:$0xff] }
  0xa8   : > { %835 = vmatprep.subr.bf16.mxu0 %v834_v30  ;;  %v356_v44 = vld [vmem:[#allocation7 + $0x60] sm:$0xff]  ;;  %v401_v47 = vld [vmem:[#allocation8 + $0x98] sm:$0xff]  ;;  %v363_v49 = vld [vmem:[#allocation7 + $0x98] sm:$0xff]  ;;  %v808_v50 = vpack.c.bf16 %v396_v42, %v394_v41  ;;  %p1080_p7 = pnand %p1079_p5, %p1073_p3 }
  0xa9   : > { %v361_v48 = vld [vmem:[#allocation7 + $0x88] sm:$0xff]  ;;  %v840_v51 = vpack.c.bf16 %v358_v45, %v356_v44  ;;  %v810_v52 = vpack.c.bf16 %v401_v47, %v399_v46  ;;  %v398_v53 = vld [vmem:[#allocation8 + $0x80] sm:$0xff]  ;;  %v400_v54 = vld [vmem:[#allocation8 + $0x90] sm:$0xff] }
  0xaa   : > { %805 = vmatpush1.bf16.msra.mxu1 %v804_v34  ;;  %v360_v55 = vld [vmem:[#allocation7 + $0x80] sm:$0xff]  ;;  %v842_v56 = vpack.c.bf16 %v363_v49, %v361_v48  ;;  %v362_v57 = vld [vmem:[#allocation7 + $0x90] sm:$0xff]  ;;  %v403_v58 = vld [vmem:[#allocation8 + $0xa8] sm:$0xff]  ;;  %v812_v62 = vpack.c.bf16 %v400_v54, %v398_v53 }
  0xab   : > { %837 = vmatpush1.bf16.msra.mxu0 %v836_v38  ;;  %807 = vmatprep.subr.bf16.mxu1 %v806_v39  ;;  %v405_v59 = vld [vmem:[#allocation8 + $0xb8] sm:$0xff]  ;;  %v367_v61 = vld [vmem:[#allocation7 + $0xb8] sm:$0xff]  ;;  %v844_v63 = vpack.c.bf16 %v362_v57, %v360_v55  ;;  %v402_v1 = vld [vmem:[#allocation8 + $0xa0] sm:$0xff] }
  0xac   : > { %839 = vmatprep.subr.bf16.mxu0 %v838_v43  ;;  %v365_v60 = vld [vmem:[#allocation7 + $0xa8] sm:$0xff]  ;;  %v814_v0 = vpack.c.bf16 %v405_v59, %v403_v58  ;;  %v404_v2 = vld [vmem:[#allocation8 + $0xb0] sm:$0xff]  ;;  %v366_v5 = vld [vmem:[#allocation7 + $0xb0] sm:$0xff] }
  0xad   : > { %v364_v3 = vld [vmem:[#allocation7 + $0xa0] sm:$0xff]  ;;  %v846_v4 = vpack.c.bf16 %v367_v61, %v365_v60  ;;  %v407_v6 = vld [vmem:[#allocation8 + $0xc8] sm:$0xff]  ;;  %v409_v7 = vld [vmem:[#allocation8 + $0xd8] sm:$0xff]  ;;  %v816_v10 = vpack.c.bf16 %v404_v2, %v402_v1 }
  0xae   : > { %809 = vmatpush1.bf16.msra.mxu1 %v808_v50  ;;  %v369_v8 = vld [vmem:[#allocation7 + $0xc8] sm:$0xff]  ;;  %v371_v9 = vld [vmem:[#allocation7 + $0xd8] sm:$0xff]  ;;  %v406_v11 = vld [vmem:[#allocation8 + $0xc0] sm:$0xff]  ;;  %v848_v12 = vpack.c.bf16 %v366_v5, %v364_v3  ;;  %v818_v13 = vpack.c.bf16 %v409_v7, %v407_v6 }
  0xaf   : > { %841 = vmatpush1.bf16.msra.mxu0 %v840_v51  ;;  %811 = vmatprep.subr.bf16.mxu1 %v810_v52  ;;  %v408_v14 = vld [vmem:[#allocation8 + $0xd0] sm:$0xff]  ;;  %v370_v16 = vld [vmem:[#allocation7 + $0xd0] sm:$0xff]  ;;  %v850_v17 = vpack.c.bf16 %v371_v9, %v369_v8  ;;  %v411_v18 = vld [vmem:[#allocation8 + $0xe8] sm:$0xff] }
  0xb0   : > { %843 = vmatprep.subr.bf16.mxu0 %v842_v56  ;;  %v368_v15 = vld [vmem:[#allocation7 + $0xc0] sm:$0xff]  ;;  %v413_v19 = vld [vmem:[#allocation8 + $0xf8] sm:$0xff]  ;;  %v375_v22 = vld [vmem:[#allocation7 + $0xf8] sm:$0xff]  ;;  %v820_v24 = vpack.c.bf16 %v408_v14, %v406_v11 }
  0xb1   : > { %v379_v20 = vld [vmem:[%s1449_s2 + $0x8] sm:$0xff]  ;;  %v852_v25 = vpack.c.bf16 %v370_v16, %v368_v15  ;;  %v822_v26 = vpack.c.bf16 %v413_v19, %v411_v18  ;;  %v410_v27 = vld [vmem:[#allocation8 + $0xe0] sm:$0xff]  ;;  %v412_v28 = vld [vmem:[#allocation8 + $0xf0] sm:$0xff] }
  0xb2   : > { %813 = vmatpush1.bf16.msra.mxu1 %v812_v62  ;;  %v373_v21 = vld [vmem:[#allocation7 + $0xe8] sm:$0xff]  ;;  %780 = vmatprep.mubr.msk.f32.mxu1 %vm416_vm0, %v379_v20  ;;  %v372_v30 = vld [vmem:[#allocation7 + $0xe0] sm:$0xff]  ;;  %v374_v31 = vld [vmem:[#allocation7 + $0xf0] sm:$0xff]  ;;  %v824_v32 = vpack.c.bf16 %v412_v28, %v410_v27 }
  0xb3   : > { %845 = vmatpush1.bf16.msra.mxu0 %v844_v63  ;;  %815 = vmatprep.subr.bf16.mxu1 %v814_v0  ;;  %v341_v23 = vld [vmem:[%s1441_s28 + $0x8] sm:$0xff]  ;;  %v854_v29 = vpack.c.bf16 %v375_v22, %v373_v21  ;;  %v856_v33 = vpack.c.bf16 %v374_v31, %v372_v30  ;;  %v415_v34 = vld [vmem:[#allocation8 + $0x108] sm:$0x1]  ;;  %v414_v36 = vld [vmem:[#allocation8 + $0x100] sm:$0x1] }
  0xb4   : > { %847 = vmatprep.subr.bf16.mxu0 %v846_v4  ;;  %784 = vmatprep.mubr.msk.f32.mxu0 %vm416_vm0, %v341_v23  ;;  %v377_v35 = vld [vmem:[#allocation7 + $0x108] sm:$0x1]  ;;  %v376_v37 = vld [vmem:[#allocation7 + $0x100] sm:$0x1]  ;;  %v381_v40 = vld [vmem:[%s1449_s2 + $0x18] sm:$0xff] }
  0xb5   : > { %v378_v38 = vld [vmem:[%s1449_s2] sm:$0xff]  ;;  %v343_v41 = vld [vmem:[%s1441_s28 + $0x18] sm:$0xff]  ;;  %v380_v42 = vld [vmem:[%s1449_s2 + $0x10] sm:$0xff] }
  0xb6   : > { %817 = vmatpush1.bf16.msra.mxu1 %v816_v10  ;;  %v340_v39 = vld [vmem:[%s1441_s28] sm:$0xff]  ;;  %v342_v43 = vld [vmem:[%s1441_s28 + $0x10] sm:$0xff] }
  0xb7   : > { %849 = vmatpush1.bf16.msra.mxu0 %v848_v12  ;;  %819 = vmatprep.subr.bf16.mxu1 %v818_v13 }
  0xb8   : > { %851 = vmatprep.subr.bf16.mxu0 %v850_v17 }
  0xba   : > { %821 = vmatpush1.bf16.msra.mxu1 %v820_v24 }
  0xbb   : > { %853 = vmatpush1.bf16.msra.mxu0 %v852_v25  ;;  %823 = vmatprep.subr.bf16.mxu1 %v822_v26 }
  0xbc   : > { %855 = vmatprep.subr.bf16.mxu0 %v854_v29 }
  0xbe   : > { %825 = vmatpush1.bf16.msra.mxu1 %v824_v32 }
  0xbf   : > { %857 = vmatpush1.bf16.msra.mxu0 %v856_v33  ;;  %778 = vmatprep.subr.msk.mxu1 %vm423_vm1, %v415_v34 }
  0xc0   : > { %782 = vmatprep.subr.msk.mxu0 %vm423_vm1, %v377_v35 }
  0xc2   : > { %779 = vmatpush1.msk.msra.mxu1 %vm423_vm1, %v414_v36 }
  0xc3   : > { %783 = vmatpush1.msk.msra.mxu0 %vm423_vm1, %v376_v37  ;;  %495 = vmatmul.mubr.f32.vlgmr.msra.gmra.mrb[0].mxu1 %v378_v38 }
  0xc4   : > { %584 = vmatmul.mubr.f32.vlgmr.msra.gmra.mrb[0].mxu0 %v340_v39  ;;  %781 = vmatprep.mubr.msk.f32.mxu1 %vm416_vm0, %v381_v40 }
  0xc5   : > { %785 = vmatprep.mubr.msk.f32.mxu0 %vm416_vm0, %v343_v41 }
  0xc7   : > { %501 = vmatmul.mubr.f32.gmra.mrb[2].mxu1 %v380_v42 }
  0xc8   : > { %590 = vmatmul.mubr.f32.gmra.mrb[2].mxu0 %v342_v43 }
 0x196   : > { %v496_v44 = vpop.f32.mrb[0].mxu1 }
 0x197   : > { %v585_v45 = vpop.f32.mrb[0].mxu0  ;;  %v498_v46 = vpop.f32.mrb[1].mxu1 }
 0x198   : > { %v586_v47 = vadd.f32 %v585_v45, %v496_v44  ;;  %v587_v48 = vpop.f32.mrb[1].mxu0 }
 0x199   : > { %v588_v49 = vadd.f32 %v587_v48, %v498_v46 }
 0x19a   : > { %596 = vst [vmem:[%s333_s21] sm:$0xff] %v586_v47  ;;  %v502_v50 = vpop.f32.mrb[2].mxu1 }
 0x19b   : > { %597 = vst [vmem:[%s333_s21 + $0x8] sm:$0xff] %v588_v49  ;;  %v591_v51 = vpop.f32.mrb[2].mxu0  ;;  %v504_v52 = vpop.f32.mrb[3].mxu1 }
 0x19c   : > { %v592_v53 = vadd.f32 %v591_v51, %v502_v50  ;;  %v593_v54 = vpop.f32.mrb[3].mxu0 }
 0x19d   : > { %v594_v55 = vadd.f32 %v593_v54, %v504_v52 }
 0x19e   : > { %598 = vst [vmem:[%s333_s21 + $0x10] sm:$0xff] %v592_v53 }
 0x19f   : > { %599 = vst [vmem:[%s333_s21 + $0x18] sm:$0xff] %v594_v55 }
 0x1a0   : > { %1083 = shalt.err (!%p1080_p7)
}
 0x1a1   : > { %s1084_s30 = scalar_lea.hbm %s1482_s27, 512  ;;  %s1088_s0 = scalar_lea.hbm %s1535_s4, 1024 }
 0x1a2   : > { %p1085_p12 = scmp.ne.s32.totalorder %s1482_s27, %s1084_s30  ;;  %p1089_p11 = scmp.lt.u32.totalorder %s1482_s27, %s1535_s4 }
 0x1a3   : > { %p1090_p13 = scmp.lt.u32.totalorder %s1088_s0, %s1084_s30  ;;  %p1092_p2 = scmp.lt.u32.totalorder %s1084_s30, %s1482_s27 }
 0x1a4   : > { %p1086_p1 = pnand %p1085_p12, %p1567_p6 }
 0x1a5   : > { %p1091_p0 = por %p1090_p13, %p1089_p11 }
 0x1a6   : > { %p1087_p8 = pneg %p1086_p1 }
 0x1a7   : > { %p1093_p10 = por %p1092_p2, %p1091_p0 }
 0x1a9   : > { %p1094_p3 = pnand %p1093_p10, %p1087_p8 }
 0x1ab   : > { %1097 = shalt.err (!%p1094_p3)
}
 0x1ac   : > { %s1173_s28 = smov 256   ;;  %s1174_s25 = smov 16  }
 0x1ad   : > { %874 = dma.vmem_to_hbm [thread:$0]  (%p1567_p6), %s1477_s23, 512, %s1482_s27, %s601_s18, %s1173_s28, %s1173_s28, %s1174_s25  }
 0x1ae PF: > { %s634_s8 = sand.u32 1, %s1144_s15   ;;  %p1568_p4 = scmp.ne.s32.totalorder %s1550_s24, 0 }
 0x1af   : > { %p1569_p9 = scmp.ge.s32.totalorder %s1164_s20, 2  ;;  %s635_s2 = scalar_lea.sflag [#allocation4], %s634_s8 }
 0x1b1   : > { %p891_p5 = pnand %p1569_p9, %p1568_p4 }
 0x1b3   : > { %1139 = dma.done.wait (!%p891_p5), %s635_s2, 512  }
 0x1b4   : > { %1141 = vsyncadd (!%p891_p5), %s635_s2, 4294966784  ;;  %s24_s20 = sadd.s32 1, %s1164_s20   ;;  %s1570_s18 = sld [smem:[#allocation16_spill]] }
 0x1b5   : > { %p21_p7 = scmp.ge.s32.totalorder %s24_s20, 4   ;;  %s1571_s19 = sld [smem:[#allocation17_spill]] }
 0x1b6   : > { %s1572_s15 = smov %s1148_s16  ;;  %s1573_s16 = smov %s1152_s17 }
 0x1b7   : > { %s1574_s17 = smov %s1346_s7  ;;  %23 = sbr.rel (!%p21_p7) target bundleno = 13 (0xd), region = 104 }
 0x1be   :  { %640 = vsyncpa [#allocation3], 1 }
 0x1bf   :  { %642 = vsyncpa [#allocation3 + $0x1], 1 }
 0x1c0   :  { %643 = vsyncpa [#allocation6], 1 }
 0x1c1   :  { %645 = vsyncpa [#allocation6 + $0x1], 1 }
 0x1c2   :  { %646 = vsyncpa [#allocation9], 1 }
 0x1c3   :  { %647 = vsyncpa [#allocation4], 1 }
 0x1c4   :  { %649 = vsyncpa [#allocation4 + $0x1], 1 }

</bundles_post_ra>
